<compile_context>
chip_gen: v7x
topology: tpu7x:2x2x1
jax: 0.10.0
libtpu: 0.0.40
codegen_flags: <defaults>
</compile_context>

<pallas_src>
import functools

import jax
import jax.numpy as jnp
from jax.experimental import pallas as pl
from jax.experimental.pallas import tpu as pltpu

LANE = 128


# ---------------------------------------------------------------------------
# Helpers
# ---------------------------------------------------------------------------
def _round_up(n, m):
    return ((n + m - 1) // m) * m


def _pad2d(a, rows, cols, fill=0.0):
    out = jnp.full((rows, cols), fill, a.dtype)
    return out.at[: a.shape[0], : a.shape[1]].set(a)


def _choose_tile(n_pad, cap=704):
    """Largest row tile <= cap (multiple of 8) that divides n_pad."""
    if n_pad <= cap:
        return n_pad
    for t in range(cap - (cap % 8), 7, -8):
        if n_pad % t == 0:
            return t
    return 8


# ---------------------------------------------------------------------------
# Stage 1: XW1 = x @ W1  (hoisted out of the fused kernel per review)
# ---------------------------------------------------------------------------
def xw_kernel(x_ref, w_ref, o_ref):
    o_ref[...] = jnp.dot(
        x_ref[...], w_ref[...], preferred_element_type=jnp.float32
    ).astype(o_ref.dtype)


# ---------------------------------------------------------------------------
# Stage 2: fused GCN layer 1 -> GCN layer 2 -> Linear + log-softmax
# ---------------------------------------------------------------------------
def fused_gcn_kernel(adj_ref, xw1_ref, b1_ref, w2_ref, b2_ref,
                     w3_ref, b3_ref, o_ref, hw_sc, h1_sc, *, tm):
    p = pl.program_id(0)            # phase: 0 = GCN layer 1, 1 = layer 2 + head
    i = pl.program_id(1)            # node-row tile index
    row0 = pl.multiple_of(i * tm, tm)
    # adj is VMEM-resident; slicing a row tile out of it is free (no extra DMA).
    adj_tile = adj_ref[pl.ds(row0, tm), :]

    @pl.when(p == 0)
    def _():
        agg = jnp.dot(adj_tile, xw1_ref[...], preferred_element_type=jnp.float32)
        h1 = jnp.maximum(agg + b1_ref[...], 0.0)
        # TODO(synk): nn.Dropout(0.5) is identity at inference; training-mode
        # masking is not implemented.
        h1_sc[pl.ds(row0, tm), :] = h1.astype(h1_sc.dtype)

    @pl.when(jnp.logical_and(p == 1, i == 0))
    def _():
        hw = jnp.dot(h1_sc[...], w2_ref[...], preferred_element_type=jnp.float32)
        hw_sc[...] = hw.astype(hw_sc.dtype)

    @pl.when(p == 1)
    def _():
        agg = jnp.dot(adj_tile, hw_sc[...], preferred_element_type=jnp.float32)
        h2 = jnp.maximum(agg + b2_ref[...], 0.0)
        # Classifier epilogue stays in f32: b3 carries -1e30 in the padded class
        # lanes, which never win the max and exp-underflow cleanly to zero.
        logits = jnp.dot(h2.astype(w3_ref.dtype), w3_ref[...],
                         preferred_element_type=jnp.float32) + b3_ref[...]
        m = jnp.max(logits, axis=-1, keepdims=True)
        shifted = logits - m
        lse = jnp.log(jnp.sum(jnp.exp(shifted), axis=-1, keepdims=True))
        o_ref[pl.ds(row0, tm), :] = (shifted - lse).astype(o_ref.dtype)


# ---------------------------------------------------------------------------
# Host-side wrapper: padding, BlockSpecs, grid, VMEM budgeting
# ---------------------------------------------------------------------------
def cora_gcn_forward(params, x, adj):
    n, f = x.shape
    hid1 = params["w1"].shape[1]
    hid2 = params["w2"].shape[1]
    nclass = params["w3"].shape[1]
    assert hid1 <= LANE and hid2 <= LANE and nclass <= LANE

    n_pad = _round_up(max(n, 8), LANE)
    f_pad = _round_up(f, LANE)
    hp = LANE      # hidden 100 -> 128
    cp = LANE      # nclass     -> 128 (sliced back after the call)
    tm = _choose_tile(n_pad)
    n_tiles = n_pad // tm

    bf16 = jnp.bfloat16
    adj_p = _pad2d(adj.astype(bf16), n_pad, n_pad)
    x_p = _pad2d(x.astype(bf16), n_pad, f_pad)
    w1_p = _pad2d(params["w1"].astype(bf16), f_pad, hp)
    w2_p = _pad2d(params["w2"].astype(bf16), hp, hp)
    w3_p = _pad2d(params["w3"].astype(bf16), hp, cp)
    b1_p = _pad2d(params["b1"].astype(jnp.float32).reshape(1, -1), 1, hp)
    b2_p = _pad2d(params["b2"].astype(jnp.float32).reshape(1, -1), 1, hp)
    b3_p = _pad2d(params["b3"].astype(jnp.float32).reshape(1, -1), 1, cp, fill=-1e30)

    # Constant-index (resident) blocks: fetched from HBM once, single-buffered.
    resident = lambda shape: pl.BlockSpec(
        shape, lambda p, i: (0, 0), pipeline_mode=pl.Buffered(1))

    # ---- Stage 1: XW1 = x @ W1 ----------------------------------------------
    xw1 = pl.pallas_call(
        xw_kernel,
        out_shape=jax.ShapeDtypeStruct((n_pad, hp), bf16),
        grid=(n_tiles,),
        in_specs=[
            pl.BlockSpec((tm, f_pad), lambda i: (i, 0)),           # x row tiles
            pl.BlockSpec((f_pad, hp), lambda i: (0, 0),
                         pipeline_mode=pl.Buffered(1)),            # W1 resident
        ],
        out_specs=pl.BlockSpec((tm, hp), lambda i: (i, 0)),
        compiler_params=pltpu.CompilerParams(
            dimension_semantics=("parallel",)),
    )(x_p, w1_p)

    # ---- Stage 2: fused GCN x2 + classifier ---------------------------------
    footprint = (
        n_pad * n_pad * 2             # adj resident, bf16, single buffer
        + n_pad * hp * 2              # XW1 resident
        + n_pad * cp * 4              # output resident, f32
        + 2 * n_pad * hp * 2          # h1 / H1@W2 scratch
        + (hp * hp + hp * cp) * 2     # W2, W3
        + 3 * 8 * LANE * 4            # padded bias rows
    )
    vmem_limit = int(footprint + 16 * 1024 * 1024)   # generous compiler margin

    out = pl.pallas_call(
        functools.partial(fused_gcn_kernel, tm=tm),
        out_shape=jax.ShapeDtypeStruct((n_pad, cp), jnp.float32),
        grid=(2, n_tiles),
        in_specs=[
            resident((n_pad, n_pad)),   # adj: VMEM-resident, read from HBM once
            resident((n_pad, hp)),      # XW1
            resident((1, hp)),          # b1
            resident((hp, hp)),         # W2
            resident((1, hp)),          # b2
            resident((hp, cp)),         # W3
            resident((1, cp)),          # b3 (-1e30 padded class lanes)
        ],
        # Output fully resident: single flush at the very end, after phase 1 has
        # written every row tile (removes the flush-on-block-change dependence).
        out_specs=pl.BlockSpec((n_pad, cp), lambda p, i: (0, 0),
                               pipeline_mode=pl.Buffered(1)),
        scratch_shapes=[
            pltpu.VMEM((n_pad, hp), bf16),   # H1 @ W2 (phase 1)
            pltpu.VMEM((n_pad, hp), bf16),   # h1 kept on-chip, never hits HBM
        ],
        compiler_params=pltpu.CompilerParams(
            # Phases are ordered and scratch is shared across row tiles, so both
            # grid axes stay "arbitrary".
            # TODO(synk): per-layer pallas_calls would let the row axis be
            # "parallel" across v7x's two TensorCores (costs an h1 HBM round trip).
            dimension_semantics=("arbitrary", "arbitrary"),
            vmem_limit_bytes=vmem_limit,
        ),
    )(adj_p, xw1, b1_p, w2_p, b2_p, w3_p, b3_p)

    return out[:n, :nclass]


# ---------------------------------------------------------------------------
# Params / reference
# ---------------------------------------------------------------------------
def init_params(key, nfeat, nclass, hidden1=100, hidden2=100):
    k1, k2, k3 = jax.random.split(key, 3)
    scale = lambda fan_in: 1.0 / jnp.sqrt(jnp.float32(fan_in))
    return {
        "w1": jax.random.uniform(k1, (nfeat, hidden1), jnp.float32, -1.0, 1.0) * scale(nfeat),
        "b1": jnp.zeros((1, hidden1), jnp.float32),
        "w2": jax.random.uniform(k2, (hidden1, hidden2), jnp.float32, -1.0, 1.0) * scale(hidden1),
        "b2": jnp.zeros((1, hidden2), jnp.float32),
        # stored as [hidden2, nclass] == W3^T of the PyTorch nn.Linear
        "w3": jax.random.uniform(k3, (hidden2, nclass), jnp.float32, -1.0, 1.0) * scale(hidden2),
        "b3": jnp.zeros((1, nclass), jnp.float32),
    }


def reference_forward(params, x, adj):
    h1 = jnp.maximum(adj @ (x @ params["w1"]) + params["b1"], 0.0)
    h2 = jnp.maximum(adj @ (h1 @ params["w2"]) + params["b2"], 0.0)
    logits = h2 @ params["w3"] + params["b3"]
    return jax.nn.log_softmax(logits, axis=1)


if __name__ == "__main__":
    key = jax.random.PRNGKey(0)
    kx, ka, kp = jax.random.split(key, 3)

    # Small, deterministic synthetic graph: N nodes, nfeat features, nclass classes.
    N, NFEAT, NCLASS = 64, 32, 7

    x = jax.random.normal(kx, (N, NFEAT), jnp.float32)

    # Symmetric, row-normalized adjacency with self-loops (typical GCN preprocessing).
    a = (jax.random.uniform(ka, (N, N)) < 0.05).astype(jnp.float32)
    a = jnp.maximum(a, a.T) + jnp.eye(N, dtype=jnp.float32)
    deg = jnp.sum(a, axis=1, keepdims=True)
    adj = a / deg

    params = init_params(kp, NFEAT, NCLASS)

    out = cora_gcn_forward(params, x, adj)
    out = jax.block_until_ready(out)

    assert out.shape == (N, NCLASS)
    # log-softmax rows should sum to ~1 after exp
    assert jnp.allclose(jnp.sum(jnp.exp(out), axis=1), 1.0, atol=1e-3)
    # bf16-MXU kernel should closely track the f32 reference
    ref = reference_forward(params, x, adj)
    assert float(jnp.max(jnp.abs(out - ref))) < 0.1

    print("KERNEL_OK")
</pallas_src>

<mosaic_0001>
module attributes {stable_mosaic.version = 11 : i64} {
  func.func @xw_kernel(%arg0: i32, %arg1: memref<128x128xbf16, #tpu.memory_space<vmem>>, %arg2: memref<128x128xbf16, #tpu.memory_space<vmem>>, %arg3: memref<128x128xbf16, #tpu.memory_space<vmem>>) attributes {dimension_semantics = [#tpu.dimension_semantics<parallel>], iteration_bounds = array<i64: 1>, scalar_prefetch = 0 : i64, scratch_operands = 0 : i64, tpu.core_type = #tpu.core_type<tc>, window_params = [{transform_indices = @transform_0, window_bounds = array<i64: 128, 128>}, {pipeline_mode = #tpu.pipeline_mode<synchronous>, transform_indices = @transform_1, window_bounds = array<i64: 128, 128>}, {transform_indices = @transform_2, window_bounds = array<i64: 128, 128>}]} {
    %c0 = arith.constant 0 : index
    %c0_0 = arith.constant 0 : index
    %0 = vector.load %arg1[%c0, %c0_0] : memref<128x128xbf16, #tpu.memory_space<vmem>>, vector<128x128xbf16>
    %c0_1 = arith.constant 0 : index
    %c0_2 = arith.constant 0 : index
    %1 = vector.load %arg2[%c0_1, %c0_2] : memref<128x128xbf16, #tpu.memory_space<vmem>>, vector<128x128xbf16>
    %cst = arith.constant dense<0.000000e+00> : vector<128x128xf32>
    %2 = tpu.matmul %0, %1, %cst {dimension_numbers = #tpu.dot_dimension_numbers<[1], [0], [0], [1], [0, 0, 1, 1], [], []>} : vector<128x128xbf16>, vector<128x128xbf16>, vector<128x128xf32> -> vector<128x128xf32>
    %3 = arith.truncf %2 : vector<128x128xf32> to vector<128x128xbf16>
    %c0_3 = arith.constant 0 : index
    %c0_4 = arith.constant 0 : index
    %4 = vector.load %arg3[%c0_3, %c0_4] : memref<128x128xbf16, #tpu.memory_space<vmem>>, vector<128x128xbf16>
    tpu.vector_store %arg3[%c0_3, %c0_4], %3 {strides = array<i32>} : memref<128x128xbf16, #tpu.memory_space<vmem>>, vector<128x128xbf16>,
    return
  }
  func.func @transform_0(%arg0: i32) -> (i32, i32) {
    %c0_i32 = arith.constant 0 : i32
    %c0_i32_0 = arith.constant 0 : i32
    return %arg0, %c0_i32 : i32, i32
  }
  func.func @transform_1(%arg0: i32) -> (i32, i32) {
    %c0_i32 = arith.constant 0 : i32
    %c0_i32_0 = arith.constant 0 : i32
    %c0_i32_1 = arith.constant 0 : i32
    return %c0_i32, %c0_i32_0 : i32, i32
  }
  func.func @transform_2(%arg0: i32) -> (i32, i32) {
    %c0_i32 = arith.constant 0 : i32
    %c0_i32_0 = arith.constant 0 : i32
    return %arg0, %c0_i32 : i32, i32
  }
}

</mosaic_0001>

<bundles_post_ra>
// kernel: tpu_custom_call.1
= control target key start
LH: loop header
LB: loop body
LE: loop exit
PB: predicated region body
PF: predicated region fallthrough
CT: control target
= control target key end

     0   :  { %7 = vsyncpa [#allocation3], 0  ;;  %s681_s0 = inlined_call_operand.hbm [shape: bf16[128,128], index: 0, kind: input, shape index: {}]   ;;  %s682_s1 = inlined_call_operand.hbm [shape: bf16[128,128], index: 1, kind: input, shape index: {}]   ;;  %s683_s2 = inlined_call_operand.hbm [shape: bf16[128,128], index: 2, kind: output, shape index: {}]  }
   0x1   :  { %8 = vsyncpa [#allocation6], 0 }
   0x2   :  { %9 = vsyncpa [#allocation4], 0  ;;  %s616_s9 = smov [#allocation2]   ;;  %s544_s13 = scalar_lea.hbm %s681_s0, 1024 }
   0x3   :  { %s15_s10 = sshll.u32 %s616_s9, 4  ;;  %p545_p0 = scmp.ne.s32.totalorder %s681_s0, %s544_s13  ;;  %s16_s10 = int_to_ptr.vmem [resolvable:$true] %s15_s10 }
   0x4   :  { %p548_p1 = scmp.lt.u32.totalorder %s544_s13, %s681_s0 }
   0x6   :  { %p550_p2 = pnand %p548_p1, %p545_p0 }
   0x8   :  { %553 = shalt.err (!%p550_p2)
}
   0x9   :  { %s554_s18 = scalar_lea.vmem %s16_s10, 1024  ;;  %p559_p4 = scmp.lt.s32.totalorder %s16_s10, %s16_s10 }
   0xa   :  { %p555_p3 = scmp.ne.s32.totalorder %s16_s10, %s554_s18  ;;  %p560_p5 = scmp.lt.s32.totalorder %s554_s18, %s554_s18 }
   0xc   :  { %p561_p6 = por %p560_p5, %p559_p4 }
   0xe   :  { %p562_p7 = pnand %p561_p6, %p555_p3 }
  0x10   :  { %565 = shalt.err (!%p562_p7)
}
  0x11   :  { %s617_s19 = smov 64   ;;  %s618_s20 = smov 4  }
  0x12   :  { %21 = dma.hbm_to_vmem [thread:$0]  %s681_s0, 1024, %s16_s10, [#allocation3], %s617_s19, %s617_s19, %s618_s20  }
  0x13   :  { %s619_s23 = smov [#allocation5]   ;;  %s566_s27 = scalar_lea.hbm %s682_s1, 1024 }
  0x14   :  { %s27_s24 = sshll.u32 %s619_s23, 4  ;;  %p567_p8 = scmp.ne.s32.totalorder %s682_s1, %s566_s27  ;;  %s28_s24 = int_to_ptr.vmem [resolvable:$true] %s27_s24 }
  0x15   :  { %p570_p9 = scmp.lt.u32.totalorder %s566_s27, %s682_s1 }
  0x17   :  { %p572_p10 = pnand %p570_p9, %p567_p8 }
  0x19   :  { %575 = shalt.err (!%p572_p10)
}
  0x1a   :  { %s576_s4 = scalar_lea.vmem %s28_s24, 1024  ;;  %p581_p12 = scmp.lt.s32.totalorder %s28_s24, %s28_s24 }
  0x1b   :  { %p577_p11 = scmp.ne.s32.totalorder %s28_s24, %s576_s4  ;;  %p582_p13 = scmp.lt.s32.totalorder %s576_s4, %s576_s4 }
  0x1d   :  { %p583_p0 = por %p582_p13, %p581_p12 }
  0x1f   :  { %p584_p1 = pnand %p583_p0, %p577_p11 }
  0x21   :  { %587 = shalt.err (!%p584_p1)
}
  0x22   :  { %33 = dma.hbm_to_vmem [thread:$0]  %s682_s1, 1024, %s28_s24, [#allocation6], %s617_s19, %s617_s19, %s618_s20  }
  0x23   :  { %610 = dma.done.wait [#allocation3], 1024  }
  0x24   :  { %611 = vsyncadd [#allocation3], 4294966272 }
  0x25   :  { %612 = dma.done.wait [#allocation6], 1024  }
  0x26   :  { %613 = vsyncadd [#allocation6], 4294966272  ;;  %v528_v0 = vld [vmem:[#allocation5] sm:$0xff]   ;;  %v529_v1 = vld [vmem:[#allocation5 + $0x8] sm:$0xff]   ;;  %s620_s1 = smov [#allocation7]  }
  0x27   :  { %475 = vmatprep.subr.bf16.mxu0 %v528_v0  ;;  %507 = vmatprep.subr.bf16.mxu1 %v528_v0  ;;  %v530_v2 = vld [vmem:[#allocation5 + $0x10] sm:$0xff]   ;;  %v531_v3 = vld [vmem:[#allocation5 + $0x18] sm:$0xff]   ;;  %v536_v4 = vld [vmem:[#allocation2] sm:$0xff]   ;;  %s351_s6 = sshll.u32 %s620_s1, 4  ;;  %s352_s6 = int_to_ptr.vmem [resolvable:$true] %s351_s6 }
  0x28   :  { %476 = vmatpush3.bf16.msra.mxu0 %v528_v0  ;;  %515 = vmatpush3.bf16.msra.mxu1 %v528_v0  ;;  %v537_v5 = vld [vmem:[#allocation2 + $0x20] sm:$0xff]   ;;  %v533_v7 = vld [vmem:[#allocation5 + $0x28] sm:$0xff]   ;;  %v534_v8 = vld [vmem:[#allocation5 + $0x30] sm:$0xff]   ;;  %s588_s7 = scalar_lea.vmem %s352_s6, 1024  ;;  %p593_p3 = scmp.lt.s32.totalorder %s352_s6, %s352_s6 }
  0x29   :  { %477 = vmatprep.subr.bf16.mxu0 %v529_v1  ;;  %508 = vmatprep.subr.bf16.mxu1 %v529_v1  ;;  %v532_v6 = vld [vmem:[#allocation5 + $0x20] sm:$0xff]   ;;  %v535_v9 = vld [vmem:[#allocation5 + $0x38] sm:$0xff]   ;;  %v538_v10 = vld [vmem:[#allocation2 + $0x8] sm:$0xff]   ;;  %p589_p2 = scmp.ne.s32.totalorder %s352_s6, %s588_s7  ;;  %p594_p4 = scmp.lt.s32.totalorder %s588_s7, %s588_s7 }
  0x2a   :  { %491 = vmatprep.mubr.bf16.mxu0 %v536_v4  ;;  %499 = vmatprep.mubr.bf16.mxu1 %v537_v5  ;;  %v539_v11 = vld [vmem:[#allocation2 + $0x28] sm:$0xff]   ;;  %v540_v12 = vld [vmem:[#allocation2 + $0x10] sm:$0xff]   ;;  %v542_v14 = vld [vmem:[#allocation2 + $0x18] sm:$0xff]  }
  0x2b   :  { %v541_v13 = vld [vmem:[#allocation2 + $0x30] sm:$0xff]   ;;  %v543_v15 = vld [vmem:[#allocation2 + $0x38] sm:$0xff]   ;;  %p595_p5 = por %p594_p4, %p593_p3 }
  0x2c   :  { %478 = vmatpush3.bf16.msra.mxu0 %v529_v1  ;;  %516 = vmatpush3.bf16.msra.mxu1 %v529_v1 }
  0x2d   :  { %479 = vmatprep.subr.bf16.mxu0 %v530_v2  ;;  %509 = vmatprep.subr.bf16.mxu1 %v530_v2  ;;  %p596_p6 = pnand %p595_p5, %p589_p2 }
  0x30   :  { %480 = vmatpush3.bf16.msra.mxu0 %v530_v2  ;;  %517 = vmatpush3.bf16.msra.mxu1 %v530_v2 }
  0x31   :  { %481 = vmatprep.subr.bf16.mxu0 %v531_v3  ;;  %510 = vmatprep.subr.bf16.mxu1 %v531_v3 }
  0x34   :  { %482 = vmatpush3.bf16.msra.mxu0 %v531_v3  ;;  %518 = vmatpush3.bf16.msra.mxu1 %v531_v3 }
  0x35   :  { %483 = vmatprep.subr.bf16.mxu0 %v532_v6  ;;  %511 = vmatprep.subr.bf16.mxu1 %v532_v6 }
  0x38   :  { %484 = vmatpush3.bf16.msra.mxu0 %v532_v6  ;;  %519 = vmatpush3.bf16.msra.mxu1 %v532_v6 }
  0x39   :  { %485 = vmatprep.subr.bf16.mxu0 %v533_v7  ;;  %512 = vmatprep.subr.bf16.mxu1 %v533_v7 }
  0x3c   :  { %486 = vmatpush3.bf16.msra.mxu0 %v533_v7  ;;  %520 = vmatpush3.bf16.msra.mxu1 %v533_v7 }
  0x3d   :  { %487 = vmatprep.subr.bf16.mxu0 %v534_v8  ;;  %513 = vmatprep.subr.bf16.mxu1 %v534_v8 }
  0x40   :  { %488 = vmatpush3.bf16.msra.mxu0 %v534_v8  ;;  %521 = vmatpush3.bf16.msra.mxu1 %v534_v8 }
  0x41   :  { %489 = vmatprep.subr.bf16.mxu0 %v535_v9  ;;  %514 = vmatprep.subr.bf16.mxu1 %v535_v9 }
  0x44   :  { %490 = vmatpush3.bf16.msra.mxu0 %v535_v9  ;;  %522 = vmatpush3.bf16.msra.mxu1 %v535_v9 }
  0x47   :  { %492 = vmatmul.mubr.bf16.vlgmr.msra.gmra.mrb[0].mxu0 %v538_v10  ;;  %500 = vmatmul.mubr.bf16.vlgmr.msra.gmra.mrb[0].mxu1 %v539_v11 }
  0x48   :  { %495 = vmatprep.mubr.bf16.mxu0 %v540_v12  ;;  %503 = vmatprep.mubr.bf16.mxu1 %v541_v13 }
  0x4f   :  { %496 = vmatmul.mubr.bf16.gmra.mrb[4].mxu0 %v542_v14  ;;  %504 = vmatmul.mubr.bf16.gmra.mrb[4].mxu1 %v543_v15 }
 0x11a   :  { %v493_v16 = vpop.f32.mrb[0].mxu0  ;;  %v501_v17 = vpop.f32.mrb[0].mxu1 }
 0x11b   :  { %v203_v18 = vpop.f32.mrb[1].mxu0  ;;  %v235_v19 = vpop.f32.mrb[1].mxu1 }
 0x11c   :  { %v494_v20 = vpop.f32.mrb[2].mxu0  ;;  %v502_v21 = vpop.f32.mrb[2].mxu1 }
 0x11d   :  { %v420_v22 = vpack.c.bf16 %v494_v20, %v493_v16  ;;  %v440_v23 = vpack.c.bf16 %v502_v21, %v501_v17  ;;  %v206_v24 = vpop.f32.mrb[3].mxu0  ;;  %v238_v25 = vpop.f32.mrb[3].mxu1 }
 0x11e   :  { %v415_v26 = vpack.c.bf16 %v206_v24, %v203_v18  ;;  %v435_v27 = vpack.c.bf16 %v238_v25, %v235_v19 }
 0x11f   :  { %452 = vst [vmem:[#allocation7 + $0x8] sm:$0xff] %v420_v22   ;;  %456 = vst [vmem:[#allocation7 + $0x28] sm:$0xff] %v440_v23  }
 0x120   :  { %416 = vst [vmem:[#allocation7] sm:$0xff] %v415_v26   ;;  %455 = vst [vmem:[#allocation7 + $0x20] sm:$0xff] %v435_v27  }
 0x122   :  { %v497_v28 = vpop.f32.mrb[4].mxu0  ;;  %v505_v29 = vpop.f32.mrb[4].mxu1 }
 0x123   :  { %v219_v30 = vpop.f32.mrb[5].mxu0  ;;  %v251_v31 = vpop.f32.mrb[5].mxu1 }
 0x124   :  { %v498_v32 = vpop.f32.mrb[6].mxu0  ;;  %v506_v33 = vpop.f32.mrb[6].mxu1 }
 0x125   :  { %v430_v34 = vpack.c.bf16 %v498_v32, %v497_v28  ;;  %v450_v35 = vpack.c.bf16 %v506_v33, %v505_v29  ;;  %v222_v36 = vpop.f32.mrb[7].mxu0  ;;  %v254_v37 = vpop.f32.mrb[7].mxu1 }
 0x126   :  { %v425_v38 = vpack.c.bf16 %v222_v36, %v219_v30  ;;  %v445_v39 = vpack.c.bf16 %v254_v37, %v251_v31 }
 0x127   :  { %454 = vst [vmem:[#allocation7 + $0x18] sm:$0xff] %v430_v34   ;;  %458 = vst [vmem:[#allocation7 + $0x38] sm:$0xff] %v450_v35  }
 0x128   :  { %453 = vst [vmem:[#allocation7 + $0x10] sm:$0xff] %v425_v38   ;;  %457 = vst [vmem:[#allocation7 + $0x30] sm:$0xff] %v445_v39  }
 0x129   :  { %599 = shalt.err (!%p596_p6)
}
 0x12a   :  { %s600_s10 = scalar_lea.hbm %s683_s2, 1024 }
 0x12b   :  { %p601_p7 = scmp.ne.s32.totalorder %s683_s2, %s600_s10  ;;  %p604_p8 = scmp.lt.u32.totalorder %s600_s10, %s683_s2 }
 0x12d   :  { %p606_p9 = pnand %p604_p8, %p601_p7 }
 0x12f   :  { %609 = shalt.err (!%p606_p9)
}
 0x130   :  { %357 = dma.vmem_to_hbm [thread:$0]  %s352_s6, 1024, %s683_s2, [#allocation4], %s617_s19, %s617_s19, %s618_s20  }
 0x131   :  { %614 = dma.done.wait [#allocation4], 1024  }
 0x132   :  { %615 = vsyncadd [#allocation4], 4294966272 }
 0x133   :  { %361 = vsyncpa [#allocation3], 1 }
 0x134   :  { %362 = vsyncpa [#allocation6], 1 }
 0x135   :  { %363 = vsyncpa [#allocation4], 1 }

</bundles_post_ra>
